<compile_context>
chip_gen: v6e
topology: v6e:2x2x1
jax: 0.10.0
libtpu: 0.0.40
codegen_flags: <defaults>
</compile_context>

<pallas_src>
import math
from typing import NamedTuple, Optional

import jax
import jax.numpy as jnp
from jax.experimental import pallas as pl
from jax.experimental.pallas import tpu as pltpu

LN_EPS = 1e-6
_GELU_C = math.sqrt(2.0 / math.pi)  # gelu_new (tanh approximation)


def _round_up(x, m):
    return (x + m - 1) // m * m


# --------------------------------- kernel -----------------------------------

def _t5_ff_kernel(x_ref, ln_w_ref, wi_ref, wo_ref, o_ref, normed_ref, acc_ref):
    """One (token_tile i, d_ff chunk k) grid step.

    x_ref     : (Tm, D)      input tokens (resident across the k axis)
    ln_w_ref  : (1, D)       T5LayerNorm weight
    wi_ref    : (D, 2*tff)   fused [wi_0 chunk | wi_1 chunk]  (compute dtype)
    wo_ref    : (tff, D)     output projection chunk          (compute dtype)
    o_ref     : (Tm, D)      output (written only on the last k chunk)
    normed_ref: (Tm, D)      VMEM scratch: cached RMS-normed tokens
    acc_ref   : (Tm, D)      VMEM scratch: f32 accumulator, seeded with residual
    """
    k = pl.program_id(1)
    tff = wo_ref.shape[0]

    @pl.when(k == 0)
    def _init():
        # --- T5LayerNorm: RMS norm, no mean subtraction, no bias (f32 math) ---
        xf = x_ref[...].astype(jnp.float32)
        var = jnp.mean(xf * xf, axis=-1, keepdims=True)
        normed = ln_w_ref[...].astype(jnp.float32) * (xf * jax.lax.rsqrt(var + LN_EPS))
        normed_ref[...] = normed.astype(normed_ref.dtype)
        # Seed the accumulator with the residual so finalize is just a store.
        acc_ref[...] = xf

    normed = normed_ref[...]

    # --- fused gate+linear projection: one MXU pass, f32 accumulation ---
    h01 = jnp.dot(normed, wi_ref[...], preferred_element_type=jnp.float32)
    h0 = h01[:, :tff]          # wi_0 path (gate)
    h1 = h01[:, tff:]          # wi_1 path (linear)

    # gelu_new: 0.5*x*(1 + tanh(sqrt(2/pi)*(x + 0.044715*x^3)))  (VPU + EUP tanh)
    gelu = 0.5 * h0 * (1.0 + jnp.tanh(_GELU_C * (h0 + 0.044715 * h0 * h0 * h0)))
    h = (gelu * h1).astype(wo_ref.dtype)       # dropout -> identity (eval mode)

    acc_ref[...] += jnp.dot(h, wo_ref[...], preferred_element_type=jnp.float32)

    @pl.when(k == pl.num_programs(1) - 1)
    def _finalize():
        o_ref[...] = acc_ref[...].astype(o_ref.dtype)


# ---------------------------- parameter prep --------------------------------

class T5FFParams(NamedTuple):
    ln_w2d: jax.Array      # (1, D)           layer-norm weight, lane-major
    wi_fused: jax.Array    # (D, 2*d_ff_pad)  chunk-interleaved [wi0_k | wi1_k]
    wo: jax.Array          # (d_ff_pad, D)
    d_ff: int              # un-padded d_ff (for FLOP accounting)
    tff: int               # d_ff chunk size


def prepare_t5_ff_params(ln_weight, wi0, wi1, wo, *,
                         ff_tile=2048, compute_dtype=jnp.bfloat16):
    """Cast / pad / fuse the weights ONCE (hoisted out of the per-call path).

    wi0, wi1: [d_model, d_ff] (i.e. nn.Linear weight transposed to [in, out]).
    wo      : [d_ff, d_model].
    ff_tile : d_ff chunk size when d_ff doesn't fit a single chunk
              (~2048 on v6e/v7x, 512-1024 on v5e; must be a multiple of 128).
    """
    D, d_ff = wi0.shape
    if d_ff <= ff_tile:
        tff = d_ff
        d_ff_pad = d_ff
    else:
        assert ff_tile % 128 == 0, "ff_tile must be a multiple of 128"
        tff = ff_tile
        d_ff_pad = _round_up(d_ff, tff)

    wi0c = wi0.astype(compute_dtype)
    wi1c = wi1.astype(compute_dtype)
    woc = wo.astype(compute_dtype)
    if d_ff_pad != d_ff:
        pad = d_ff_pad - d_ff
        # gelu(0) * 0 = 0 and the padded wo rows are zero -> padding contributes nothing.
        wi0c = jnp.pad(wi0c, ((0, 0), (0, pad)))
        wi1c = jnp.pad(wi1c, ((0, 0), (0, pad)))
        woc = jnp.pad(woc, ((0, pad), (0, 0)))

    nk = d_ff_pad // tff
    # Chunk-interleave so a single (D, 2*tff) block k holds [wi0_k | wi1_k].
    wi_fused = jnp.concatenate(
        [wi0c.reshape(D, nk, tff), wi1c.reshape(D, nk, tff)], axis=2
    ).reshape(D, nk * 2 * tff)

    return T5FFParams(ln_weight.reshape(1, D), wi_fused, woc, d_ff, tff)


# -------------------------------- wrapper ------------------------------------

def _default_token_tile():
    # Weight-streaming intensity is Tm FLOP/byte: v6e/v7x want Tm>=~384-512,
    # v5e is already MXU-bound at ~256.
    try:
        kind = jax.devices()[0].device_kind.lower()
    except Exception:
        return 512
    if "v5 lite" in kind or "v5e" in kind or "v5lite" in kind:
        return 256
    return 512


def t5_layer_ff_apply(hidden_states, params: T5FFParams, *,
                      token_tile: Optional[int] = None,
                      vmem_limit_bytes: Optional[int] = None,
                      weight_buffer_count: Optional[int] = None):
    """Apply T5LayerFF with pre-prepared params.

    token_tile: rows of the M tile. 512-1024 on v6e, 384-512 on v7x (64 MiB
                VMEM), ~256 on v5e. Rounded to the dtype-aware sublane pack.
    weight_buffer_count: optional pl.Buffered(n) on the weight BlockSpecs
                (e.g. 1 to single-buffer VMEM-resident weights on v7x).
    """
    B, S, D = hidden_states.shape
    tff = params.tff
    d_ff_pad = params.wi_fused.shape[1] // 2
    nk = d_ff_pad // tff
    compute_dtype = params.wi_fused.dtype

    N = B * S
    xbytes = hidden_states.dtype.itemsize
    # Sublane packing: 8 rows for 32-bit I/O, 16 for bf16, 32 for 8-bit.
    row_align = 8 * max(1, 4 // max(1, xbytes))
    if token_tile is None:
        token_tile = _default_token_tile()
    Tm = min(_round_up(token_tile, row_align), _round_up(N, row_align))
    N_pad = _round_up(N, Tm)

    x2d = hidden_states.reshape(N, D)
    if N_pad != N:
        x2d = jnp.pad(x2d, ((0, N_pad - N), (0, 0)))

    grid = (N_pad // Tm, nk)

    def _wspec(shape, index_map):
        if weight_buffer_count is None:
            return pl.BlockSpec(shape, index_map)
        return pl.BlockSpec(shape, index_map,
                            pipeline_mode=pl.Buffered(weight_buffer_count))

    wbytes = jnp.dtype(compute_dtype).itemsize
    obytes = hidden_states.dtype.itemsize
    lnbytes = params.ln_w2d.dtype.itemsize

    # --- VMEM footprint -> explicit limit (review: budget for v7x's 64 MiB) ---
    if vmem_limit_bytes is None:
        nbuf_w = 2 if weight_buffer_count is None else weight_buffer_count
        footprint = (
            2 * Tm * D * xbytes                      # x tile (double-buffered)
            + 2 * D * lnbytes                        # ln weight
            + nbuf_w * (D * 2 * tff + tff * D) * wbytes   # fused wi + wo chunks
            + 2 * Tm * D * obytes                    # output tile
            + Tm * D * (wbytes + 4)                  # normed + f32 acc scratch
        )
        vmem_limit_bytes = max(32 << 20, min(int(footprint * 1.3) + (4 << 20),
                                             100 << 20))

    # --- advisory cost estimate reflecting the actual schedule ---
    num_tok_tiles = N_pad // Tm
    # With nk == 1 the weight block index is constant over the grid, so weights
    # are DMA'd from HBM exactly once; with nk > 1 they re-stream per token tile.
    weight_passes = num_tok_tiles if nk > 1 else 1
    cost = pl.CostEstimate(
        flops=6 * N * D * params.d_ff,               # fused wi (4*N*D*dff) + wo (2*N*D*dff)
        transcendentals=N * params.d_ff,             # tanh per gate element
        bytes_accessed=(N_pad * D * (xbytes + obytes)
                        + weight_passes * 3 * D * d_ff_pad * wbytes
                        + D * lnbytes),
    )

    out = pl.pallas_call(
        _t5_ff_kernel,
        out_shape=jax.ShapeDtypeStruct((N_pad, D), hidden_states.dtype),
        grid_spec=pltpu.PrefetchScalarGridSpec(
            num_scalar_prefetch=0,
            grid=grid,
            in_specs=[
                pl.BlockSpec((Tm, D), lambda i, k: (i, 0)),       # x tile (resident over k)
                pl.BlockSpec((1, D), lambda i, k: (0, 0)),        # layer-norm weight
                _wspec((D, 2 * tff), lambda i, k: (0, k)),        # fused [wi0|wi1] chunk
                _wspec((tff, D), lambda i, k: (k, 0)),            # wo chunk
            ],
            out_specs=pl.BlockSpec((Tm, D), lambda i, k: (i, 0)),
            scratch_shapes=[
                pltpu.VMEM((Tm, D), compute_dtype),   # cached RMS-normed tokens
                pltpu.VMEM((Tm, D), jnp.float32),     # f32 accumulator (residual-seeded)
            ],
        ),
        compiler_params=pltpu.CompilerParams(
            dimension_semantics=("parallel", "arbitrary"),
            vmem_limit_bytes=vmem_limit_bytes,
        ),
        cost_estimate=cost,
    )(x2d, params.ln_w2d, params.wi_fused, params.wo)

    if N_pad != N:
        out = out[:N]
    return out.reshape(B, S, D)


def t5_layer_ff(hidden_states, ln_weight, wi0, wi1, wo, *,
                token_tile=None, ff_tile=2048, compute_dtype=jnp.bfloat16,
                vmem_limit_bytes=None, weight_buffer_count=None):
    """Convenience wrapper (prep + apply). For repeated forwards, call
    prepare_t5_ff_params() once and reuse the result with t5_layer_ff_apply()."""
    params = prepare_t5_ff_params(ln_weight, wi0, wi1, wo,
                                  ff_tile=ff_tile, compute_dtype=compute_dtype)
    return t5_layer_ff_apply(hidden_states, params,
                             token_tile=token_tile,
                             vmem_limit_bytes=vmem_limit_bytes,
                             weight_buffer_count=weight_buffer_count)


# TODO(synk): only the 'gated-gelu' feed_forward_proj variant is implemented
# (the 'relu' T5DenseReluDense path is not); dropout is identity (eval mode).


# ------------------------------ reference ------------------------------------

def reference_t5_layer_ff(x, ln_weight, wi0, wi1, wo):
    xf = x.astype(jnp.float32)
    var = jnp.mean(xf * xf, axis=-1, keepdims=True)
    normed = ln_weight.astype(jnp.float32) * (xf * jax.lax.rsqrt(var + LN_EPS))
    h0 = normed @ wi0.astype(jnp.float32)
    h1 = normed @ wi1.astype(jnp.float32)
    gelu = 0.5 * h0 * (1.0 + jnp.tanh(_GELU_C * (h0 + 0.044715 * h0 ** 3)))
    y = (gelu * h1) @ wo.astype(jnp.float32)
    return (xf + y).astype(x.dtype)


if __name__ == "__main__":
    key = jax.random.PRNGKey(0)

    # ---- Test 1: small T5-ish config (single d_ff chunk path) ----
    B, S, D, DFF = 2, 8, 32, 64
    k_x, k_ln, k0, k1, k2 = jax.random.split(key, 5)
    x = jax.random.normal(k_x, (B, S, D), dtype=jnp.float32)
    ln_w = jnp.ones((D,), dtype=jnp.float32) + 0.01 * jax.random.normal(k_ln, (D,))
    # nn.Linear(d_model, d_ff) weight is [d_ff, d_model]; we store W^T ([in, out]).
    wi0 = 0.05 * jax.random.normal(k0, (D, DFF), dtype=jnp.float32)
    wi1 = 0.05 * jax.random.normal(k1, (D, DFF), dtype=jnp.float32)
    wo = 0.05 * jax.random.normal(k2, (DFF, D), dtype=jnp.float32)

    ref = reference_t5_layer_ff(x, ln_w, wi0, wi1, wo)

    out = jax.block_until_ready(t5_layer_ff(x, ln_w, wi0, wi1, wo))
    assert out.shape == (B, S, D)
    # bf16 matmul operands (f32 accumulation) -> loosened tolerance vs f32 ref.
    assert jnp.allclose(out, ref, atol=2e-2, rtol=2e-2), "mismatch vs reference (test 1)"

    # f32 compute path should match tightly.
    out_f32 = jax.block_until_ready(
        t5_layer_ff(x, ln_w, wi0, wi1, wo, compute_dtype=jnp.float32))
    assert jnp.allclose(out_f32, ref, atol=1e-5, rtol=1e-5), "mismatch vs reference (f32)"

    # ---- Test 2: token padding + multi-chunk d_ff accumulation (hoisted prep) ----
    B2, S2, D2, DFF2 = 2, 13, 128, 256   # N=26 -> padded to 32; d_ff split into 2 chunks
    k_x2, k_ln2, k02, k12, k22 = jax.random.split(jax.random.PRNGKey(1), 5)
    x2 = jax.random.normal(k_x2, (B2, S2, D2), dtype=jnp.float32)
    ln_w2 = jnp.ones((D2,), dtype=jnp.float32) + 0.01 * jax.random.normal(k_ln2, (D2,))
    wi0_2 = 0.05 * jax.random.normal(k02, (D2, DFF2), dtype=jnp.float32)
    wi1_2 = 0.05 * jax.random.normal(k12, (D2, DFF2), dtype=jnp.float32)
    wo_2 = 0.05 * jax.random.normal(k22, (DFF2, D2), dtype=jnp.float32)

    params2 = prepare_t5_ff_params(ln_w2, wi0_2, wi1_2, wo_2, ff_tile=128)  # 2 k-chunks
    out2 = jax.block_until_ready(t5_layer_ff_apply(x2, params2))
    ref2 = reference_t5_layer_ff(x2, ln_w2, wi0_2, wi1_2, wo_2)
    assert out2.shape == (B2, S2, D2)
    assert jnp.allclose(out2, ref2, atol=2e-2, rtol=2e-2), "mismatch vs reference (test 2)"

    # ---- Test 3: bf16 hidden states (exercises dtype-aware sublane rounding) ----
    x3 = x2.astype(jnp.bfloat16)
    out3 = jax.block_until_ready(t5_layer_ff_apply(x3, params2))
    ref3 = reference_t5_layer_ff(x3, ln_w2, wi0_2, wi1_2, wo_2)
    assert out3.shape == (B2, S2, D2)
    assert jnp.allclose(out3.astype(jnp.float32), ref3.astype(jnp.float32),
                        atol=1e-1, rtol=1e-1), "mismatch vs reference (test 3)"

    print("KERNEL_OK")
</pallas_src>

<mosaic_0001>
module attributes {stable_mosaic.version = 11 : i64} {
  func.func @_t5_ff_kernel(%arg0: i32, %arg1: i32, %arg2: memref<16x32xf32, #tpu.memory_space<vmem>>, %arg3: memref<1x32xf32, #tpu.memory_space<vmem>>, %arg4: memref<32x128xbf16, #tpu.memory_space<vmem>>, %arg5: memref<64x32xbf16, #tpu.memory_space<vmem>>, %arg6: memref<16x32xf32, #tpu.memory_space<vmem>>, %arg7: memref<16x32xbf16, #tpu.memory_space<vmem>>, %arg8: memref<16x32xf32, #tpu.memory_space<vmem>>) attributes {dimension_semantics = [#tpu.dimension_semantics<parallel>, #tpu.dimension_semantics<arbitrary>], iteration_bounds = array<i64: 1, 1>, scalar_prefetch = 0 : i64, scratch_operands = 2 : i64, tpu.core_type = #tpu.core_type<tc>, window_params = [{transform_indices = @transform_0, window_bounds = array<i64: 16, 32>}, {pipeline_mode = #tpu.pipeline_mode<synchronous>, transform_indices = @transform_1, window_bounds = array<i64: 1, 32>}, {transform_indices = @transform_2, window_bounds = array<i64: 32, 128>}, {transform_indices = @transform_3, window_bounds = array<i64: 64, 32>}, {transform_indices = @transform_4, window_bounds = array<i64: 16, 32>}]} {
    %c0_i32 = arith.constant 0 : i32
    %0 = arith.cmpi eq, %arg1, %c0_i32 : i32
    %1 = arith.extui %0 : i1 to i32
    %c0_i32_0 = arith.constant 0 : i32
    %2 = arith.cmpi ne, %1, %c0_i32_0 : i32
    scf.if %2 {
      %c0_17 = arith.constant 0 : index
      %c0_18 = arith.constant 0 : index
      %31 = vector.load %arg2[%c0_17, %c0_18] : memref<16x32xf32, #tpu.memory_space<vmem>>, vector<16x32xf32>
      %32 = arith.mulf %31, %31 : vector<16x32xf32>
      %cst_19 = arith.constant dense<0.000000e+00> : vector<16xf32>
      %33 = vector.multi_reduction <add>, %32, %cst_19 [1] : vector<16x32xf32> to vector<16xf32>
      %34 = vector.shape_cast %33 : vector<16xf32> to vector<16x1xf32>
      %cst_20 = arith.constant 3.200000e+01 : f32
      %35 = vector.broadcast %cst_20 : f32 to vector<16x1xf32>
      %36 = arith.divf %34, %35 : vector<16x1xf32>
      %c0_21 = arith.constant 0 : index
      %c0_22 = arith.constant 0 : index
      %37 = vector.load %arg3[%c0_21, %c0_22] : memref<1x32xf32, #tpu.memory_space<vmem>>, vector<1x32xf32>
      %cst_23 = arith.constant 9.99999997E-7 : f32
      %38 = vector.broadcast %cst_23 : f32 to vector<16x1xf32>
      %39 = arith.addf %36, %38 : vector<16x1xf32>
      %40 = math.rsqrt %39 : vector<16x1xf32>
      %41 = vector.broadcast %40 : vector<16x1xf32> to vector<16x32xf32>
      %42 = arith.mulf %31, %41 : vector<16x32xf32>
      %43 = vector.broadcast %37 : vector<1x32xf32> to vector<16x32xf32>
      %44 = arith.mulf %43, %42 : vector<16x32xf32>
      %45 = arith.truncf %44 : vector<16x32xf32> to vector<16x32xbf16>
      %c0_24 = arith.constant 0 : index
      %c0_25 = arith.constant 0 : index
      %46 = vector.load %arg7[%c0_24, %c0_25] : memref<16x32xbf16, #tpu.memory_space<vmem>>, vector<16x32xbf16>
      tpu.vector_store %arg7[%c0_24, %c0_25], %45 {strides = array<i32>} : memref<16x32xbf16, #tpu.memory_space<vmem>>, vector<16x32xbf16>,
      %c0_26 = arith.constant 0 : index
      %c0_27 = arith.constant 0 : index
      %47 = vector.load %arg8[%c0_26, %c0_27] : memref<16x32xf32, #tpu.memory_space<vmem>>, vector<16x32xf32>
      tpu.vector_store %arg8[%c0_26, %c0_27], %31 {strides = array<i32>} : memref<16x32xf32, #tpu.memory_space<vmem>>, vector<16x32xf32>,
    } else {
    }
    %c0 = arith.constant 0 : index
    %c0_1 = arith.constant 0 : index
    %3 = vector.load %arg7[%c0, %c0_1] : memref<16x32xbf16, #tpu.memory_space<vmem>>, vector<16x32xbf16>
    %c0_2 = arith.constant 0 : index
    %c0_3 = arith.constant 0 : index
    %4 = vector.load %arg4[%c0_2, %c0_3] : memref<32x128xbf16, #tpu.memory_space<vmem>>, vector<32x128xbf16>
    %cst = arith.constant dense<0.000000e+00> : vector<16x128xf32>
    %5 = tpu.matmul %3, %4, %cst {dimension_numbers = #tpu.dot_dimension_numbers<[1], [0], [0], [1], [0, 0, 1, 1], [], []>} : vector<16x32xbf16>, vector<32x128xbf16>, vector<16x128xf32> -> vector<16x128xf32>
    %6 = vector.extract_strided_slice %5 {offsets = [0, 0], sizes = [16, 64], strides = [1, 1]} : vector<16x128xf32> to vector<16x64xf32>
    %7 = vector.extract_strided_slice %5 {offsets = [0, 64], sizes = [16, 64], strides = [1, 1]} : vector<16x128xf32> to vector<16x64xf32>
    %cst_4 = arith.constant 5.000000e-01 : f32
    %8 = vector.broadcast %cst_4 : f32 to vector<16x64xf32>
    %9 = arith.mulf %8, %6 : vector<16x64xf32>
    %cst_5 = arith.constant 4.471500e-02 : f32
    %10 = vector.broadcast %cst_5 : f32 to vector<16x64xf32>
    %11 = arith.mulf %10, %6 : vector<16x64xf32>
    %12 = arith.mulf %11, %6 : vector<16x64xf32>
    %13 = arith.mulf %12, %6 : vector<16x64xf32>
    %14 = arith.addf %6, %13 : vector<16x64xf32>
    %cst_6 = arith.constant 0.797884583 : f32
    %15 = vector.broadcast %cst_6 : f32 to vector<16x64xf32>
    %16 = arith.mulf %15, %14 : vector<16x64xf32>
    %17 = math.tanh %16 : vector<16x64xf32>
    %cst_7 = arith.constant 1.000000e+00 : f32
    %18 = vector.broadcast %cst_7 : f32 to vector<16x64xf32>
    %19 = arith.addf %18, %17 : vector<16x64xf32>
    %20 = arith.mulf %9, %19 : vector<16x64xf32>
    %21 = arith.mulf %20, %7 : vector<16x64xf32>
    %22 = arith.truncf %21 : vector<16x64xf32> to vector<16x64xbf16>
    %c0_8 = arith.constant 0 : index
    %c0_9 = arith.constant 0 : index
    %23 = vector.load %arg8[%c0_8, %c0_9] : memref<16x32xf32, #tpu.memory_space<vmem>>, vector<16x32xf32>
    %c0_10 = arith.constant 0 : index
    %c0_11 = arith.constant 0 : index
    %24 = vector.load %arg5[%c0_10, %c0_11] : memref<64x32xbf16, #tpu.memory_space<vmem>>, vector<64x32xbf16>
    %cst_12 = arith.constant dense<0.000000e+00> : vector<16x32xf32>
    %25 = tpu.matmul %22, %24, %cst_12 {dimension_numbers = #tpu.dot_dimension_numbers<[1], [0], [0], [1], [0, 0, 1, 1], [], []>} : vector<16x64xbf16>, vector<64x32xbf16>, vector<16x32xf32> -> vector<16x32xf32>
    %26 = arith.addf %23, %25 : vector<16x32xf32>
    %c0_13 = arith.constant 0 : index
    %c0_14 = arith.constant 0 : index
    %27 = vector.load %arg8[%c0_13, %c0_14] : memref<16x32xf32, #tpu.memory_space<vmem>>, vector<16x32xf32>
    tpu.vector_store %arg8[%c0_13, %c0_14], %26 {strides = array<i32>} : memref<16x32xf32, #tpu.memory_space<vmem>>, vector<16x32xf32>,
    %c0_i32_15 = arith.constant 0 : i32
    %28 = arith.cmpi eq, %arg1, %c0_i32_15 : i32
    %29 = arith.extui %28 : i1 to i32
    %c0_i32_16 = arith.constant 0 : i32
    %30 = arith.cmpi ne, %29, %c0_i32_16 : i32
    scf.if %30 {
      %c0_17 = arith.constant 0 : index
      %c0_18 = arith.constant 0 : index
      %31 = vector.load %arg8[%c0_17, %c0_18] : memref<16x32xf32, #tpu.memory_space<vmem>>, vector<16x32xf32>
      %c0_19 = arith.constant 0 : index
      %c0_20 = arith.constant 0 : index
      %32 = vector.load %arg6[%c0_19, %c0_20] : memref<16x32xf32, #tpu.memory_space<vmem>>, vector<16x32xf32>
      tpu.vector_store %arg6[%c0_19, %c0_20], %31 {strides = array<i32>} : memref<16x32xf32, #tpu.memory_space<vmem>>, vector<16x32xf32>,
    } else {
    }
    return
  }
  func.func @transform_0(%arg0: i32, %arg1: i32) -> (i32, i32) {
    %c0_i32 = arith.constant 0 : i32
    %c0_i32_0 = arith.constant 0 : i32
    return %arg0, %c0_i32 : i32, i32
  }
  func.func @transform_1(%arg0: i32, %arg1: i32) -> (i32, i32) {
    %c0_i32 = arith.constant 0 : i32
    %c0_i32_0 = arith.constant 0 : i32
    %c0_i32_1 = arith.constant 0 : i32
    return %c0_i32, %c0_i32_0 : i32, i32
  }
  func.func @transform_2(%arg0: i32, %arg1: i32) -> (i32, i32) {
    %c0_i32 = arith.constant 0 : i32
    %c0_i32_0 = arith.constant 0 : i32
    return %c0_i32, %arg1 : i32, i32
  }
  func.func @transform_3(%arg0: i32, %arg1: i32) -> (i32, i32) {
    %c0_i32 = arith.constant 0 : i32
    %c0_i32_0 = arith.constant 0 : i32
    return %arg1, %c0_i32 : i32, i32
  }
  func.func @transform_4(%arg0: i32, %arg1: i32) -> (i32, i32) {
    %c0_i32 = arith.constant 0 : i32
    %c0_i32_0 = arith.constant 0 : i32
    return %arg0, %c0_i32 : i32, i32
  }
}

</mosaic_0001>

<bundles_post_ra>
// kernel: tpu_custom_call.1
= control target key start
LH: loop header
LB: loop body
LE: loop exit
PB: predicated region body
PF: predicated region fallthrough
CT: control target
= control target key end

     0   :  { %vm27_vm0 = vcmask 261120   ;;  %s423_s0 = inlined_call_operand.vmem [shape: f32[16,32], index: 0, kind: input, shape index: {}]   ;;  %s424_s1 = inlined_call_operand.vmem [shape: f32[1,32], index: 1, kind: input, shape index: {}]   ;;  %s425_s2 = inlined_call_operand.vmem [shape: bf16[32,128], index: 2, kind: input, shape index: {}]   ;;  %s426_s3 = inlined_call_operand.vmem [shape: bf16[64,32], index: 3, kind: input, shape index: {}]   ;;  %s427_s4 = inlined_call_operand.hbm [shape: f32[16,32], index: 4, kind: output, shape index: {}]  }
   0x1   :  { %v23_v0 = vld [vmem:[%s423_s0] sm:$0xff]  ;;  %v24_v1 = vld [vmem:[%s423_s0 + $0x8] sm:$0xff] }
   0x2   :  { %v25_v2 = vmul.f32 %v23_v0, %v23_v0  ;;  %63 = vst.msk [vmem:[#allocation3] sm:$0xff] %vm27_vm0, %v23_v0  ;;  %v26_v3 = vmul.f32 %v24_v1, %v24_v1  ;;  %64 = vst.msk [vmem:[#allocation3 + $0x8] sm:$0xff] %vm27_vm0, %v24_v1 }
   0x4   :  { %v28_v4 = vsel %vm27_vm0, %v25_v2, 0.0  ;;  %v31_v5 = vsel %vm27_vm0, %v26_v3, 0.0 }
   0x5   :  { %29 = vadd.xlane.f32.xlu0 %v28_v4 }
   0x6   :  { %9 = vsyncpa [#allocation5], 0  ;;  %v316_v6 = vld [vmem:[%s425_s2 + $0x8] sm:$0xff]   ;;  %v353_v7 = vmov 0.0   ;;  %vm354_vm1 = vmmov 0   ;;  %v317_v8 = vld [vmem:[%s425_s2] sm:$0xff]  }
   0x7   :  { %290 = vmatprep.subr.bf16.mxu0 %v353_v7  ;;  %294 = vmatprep.mubr.msk.bf16.mxu0 %vm354_vm1, %v353_v7  ;;  %v268_v16 = vld [vmem:[%s424_s1] ss:$0 sm:$0xff]  ;;  %vm60_vm2 = vcmask 257024   ;;  %v319_v25 = vld [vmem:[%s426_s3 + $0x18] sm:$0xff]   ;;  %v320_v26 = vld [vmem:[%s426_s3 + $0x10] sm:$0xff]   ;;  %s355_s30 = smov 64  }
   0x8   :  { %291 = vmatpush3.bf16.msra.mxu0 %v316_v6  ;;  %298 = vmatprep.subr.bf16.mxu1 %v353_v7  ;;  %v321_v27 = vld [vmem:[%s426_s3 + $0x8] sm:$0xff]   ;;  %v322_v28 = vld [vmem:[%s426_s3] sm:$0xff]   ;;  %vm196_vm3 = vcmask 523264   ;;  %s356_s3 = smov [#allocation4]  }
   0x9   :  { %32 = vadd.xlane.f32.xlu0 %v31_v5  ;;  %292 = vmatprep.subr.bf16.mxu0 %v353_v7  ;;  %v162_v56 = vld [vmem:[#allocation3] sm:$0xff]  ;;  %v163_v60 = vld [vmem:[#allocation3 + $0x8] sm:$0xff]  ;;  %s257_s5 = sshll.u32 %s356_s3, 4  ;;  %s258_s5 = int_to_ptr.vmem [resolvable:$true] %s257_s5 }
   0xa   :  { %306 = vmatprep.mubr.msk.bf16.mxu1 %vm354_vm1, %v353_v7  ;;  %299 = vmatpush3.bf16.msra.mxu1 %v319_v25  ;;  %s331_s6 = scalar_lea.vmem %s258_s5, 256  ;;  %p336_p1 = scmp.lt.s32.totalorder %s258_s5, %s258_s5 }
   0xb   :  { %300 = vmatprep.subr.bf16.mxu1 %v353_v7  ;;  %p332_p0 = scmp.ne.s32.totalorder %s258_s5, %s331_s6  ;;  %p337_p2 = scmp.lt.s32.totalorder %s331_s6, %s331_s6 }
   0xc   :  { %293 = vmatpush3.bf16.msra.mxu0 %v317_v8 }
   0xd   :  { %p338_p3 = por %p337_p2, %p336_p1 }
   0xe   :  { %301 = vmatpush3.bf16.msra.mxu1 %v320_v26 }
   0xf   :  { %302 = vmatprep.subr.bf16.mxu1 %v353_v7  ;;  %p339_p4 = pnand %p338_p3, %p332_p0 }
  0x12   :  { %303 = vmatpush3.bf16.msra.mxu1 %v321_v27 }
  0x13   :  { %304 = vmatprep.subr.bf16.mxu1 %v353_v7 }
  0x16   :  { %305 = vmatpush3.bf16.msra.mxu1 %v322_v28 }
  0x8e   :  { %v30_v9 = vpop.xlane.xlu0 %29 }
  0x8f   :  { %v35_v10 = vmul.f32 0.03125, %v30_v9 }
  0x91   :  { %v38_v11 = vadd.f32 1e-06, %v35_v10 }
  0x92   :  { %v33_v12 = vpop.xlane.xlu0 %32 }
  0x93   :  { %323 = vrsqrt.f32 %v38_v11  ;;  %v36_v13 = vmul.f32 0.03125, %v33_v12 }
  0x95   :  { %v39_v14 = vadd.f32 1e-06, %v36_v13 }
  0x97   :  { %325 = vrsqrt.f32 %v39_v14 }
  0xa0   :  { %v324_v15 = vpop.eup %323 }
  0xa1   :  { %v42_v17 = vmul.f32 %v324_v15, %v23_v0 }
  0xa3   :  { %v50_v18 = vmul.f32 %v268_v16, %v42_v17 }
  0xa4   :  { %v326_v19 = vpop.eup %325 }
  0xa5   :  { %v280_v20 = vpack.c.bf16 %v50_v18, %v50_v18  ;;  %v43_v21 = vmul.f32 %v326_v19, %v24_v1 }
  0xa7   :  { %61 = vst.msk [vmem:[#allocation2] sm:$0xf] %vm60_vm2, %v280_v20  ;;  %v51_v22 = vmul.f32 %v268_v16, %v43_v21 }
  0xa9   :  { %v281_v23 = vpack.c.bf16 %v51_v22, %v51_v22 }
  0xab   :  { %62 = vst.msk [vmem:[#allocation2 + $0x4] sm:$0xf] %vm60_vm2, %v281_v23 }
  0xb2   :  { %v318_v24 = vld [vmem:[#allocation2] sm:$0xff]  }
  0xb3   :  { %295 = vmatmul.mubr.msk.bf16.vlgmr.msra.gmra.mxu0 %vm27_vm0, %v318_v24 }
 0x173   :  { %v126_v29 = vpop.f32.mrf.mxu0 }
 0x174   :  { %153 = vrot.lane.b32.xlu1 %v126_v29, %s355_s30  ;;  %v135_v33 = vmul.f32 0.044715, %v126_v29  ;;  %v133_v48 = vmul.f32 0.5, %v126_v29 }
 0x175   :  { %v296_v30 = vpop.f32.mrf.mxu0 }
 0x176   :  { %v137_v35 = vmul.f32 %v135_v33, %v126_v29 }
 0x177   :  { %v129_v31 = vpop.f32.mrf.mxu0 }
 0x178   :  { %155 = vrot.lane.b32.xlu1 %v129_v31, %s355_s30  ;;  %v136_v34 = vmul.f32 0.044715, %v129_v31  ;;  %v139_v37 = vmul.f32 %v137_v35, %v126_v29  ;;  %v134_v49 = vmul.f32 0.5, %v129_v31 }
 0x179   :  { %v297_v32 = vpop.f32.mrf.mxu0 }
 0x17a   :  { %v138_v36 = vmul.f32 %v136_v34, %v129_v31  ;;  %v141_v39 = vadd.f32 %v139_v37, %v126_v29 }
 0x17c   :  { %v140_v38 = vmul.f32 %v138_v36, %v129_v31  ;;  %v143_v41 = vmul.f32 0.7978846, %v141_v39 }
 0x17e   :  { %v142_v40 = vadd.f32 %v140_v38, %v129_v31  ;;  %327 = vtanh.f32 %v143_v41 }
 0x180   :  { %v144_v42 = vmul.f32 0.7978846, %v142_v40 }
 0x182   :  { %329 = vtanh.f32 %v144_v42 }
 0x18b   :  { %v328_v43 = vpop.eup %327 }
 0x18c   :  { %v147_v45 = vadd.f32 1.0, %v328_v43 }
 0x18e   :  { %v149_v50 = vmul.f32 %v147_v45, %v133_v48 }
 0x18f   :  { %v330_v44 = vpop.eup %329 }
 0x190   :  { %v148_v46 = vadd.f32 1.0, %v330_v44 }
 0x192   :  { %v150_v51 = vmul.f32 %v148_v46, %v134_v49 }
 0x1e6   :  { %v154_v47 = vpop.permute.xlu1 %153 }
 0x1e7   :  { %v159_v53 = vmul.f32 %v154_v47, %v149_v50 }
 0x1ea   :  { %v156_v52 = vpop.permute.xlu1 %155 }
 0x1eb   :  { %v160_v54 = vmul.f32 %v156_v52, %v150_v51 }
 0x1ed   :  { %v161_v55 = vpack.c.bf16 %v160_v54, %v159_v53 }
 0x1ef   :  { %307 = vmatmul.mubr.msk.bf16.vlgmr.msra.gmra.mxu1 %vm196_vm3, %v161_v55 }
 0x2af   :  { %v234_v57 = vpop.f32.mrf.mxu1 }
 0x2b0   :  { %v241_v58 = vadd.f32 %v234_v57, %v162_v56 }
 0x2b1   :  { %v308_v59 = vpop.f32.mrf.mxu1 }
 0x2b2   :  { %243 = vst.msk [vmem:[#allocation3] sm:$0xff] %vm27_vm0, %v241_v58 }
 0x2b3   :  { %v237_v61 = vpop.f32.mrf.mxu1 }
 0x2b4   :  { %v242_v62 = vadd.f32 %v237_v61, %v163_v60 }
 0x2b5   :  { %v309_v63 = vpop.f32.mrf.mxu1 }
 0x2b6   :  { %244 = vst.msk [vmem:[#allocation3 + $0x8] sm:$0xff] %vm27_vm0, %v242_v62 }
 0x2b9   :  { %v248_v0 = vld [vmem:[#allocation3] sm:$0xff] }
 0x2ba   :  { %250 = vst.msk [vmem:[#allocation4] sm:$0xff] %vm27_vm0, %v248_v0 }
 0x2bd   :  { %v249_v1 = vld [vmem:[#allocation3 + $0x8] sm:$0xff] }
 0x2be   :  { %251 = vst.msk [vmem:[#allocation4 + $0x8] sm:$0xff] %vm27_vm0, %v249_v1 }
 0x2bf   :  { %342 = shalt.err (!%p339_p4)
}
 0x2c0   :  { %s357_s7 = smov 128   ;;  %s358_s8 = smov 8  }
 0x2c1   :  { %263 = dma.vmem_to_hbm [thread:$0]  %s258_s5, 256, %s427_s4, [#allocation5], %s357_s7, %s357_s7, %s358_s8  }
 0x2c2   :  { %351 = dma.done.wait [#allocation5], 256  }
 0x2c3   :  { %352 = vsyncadd [#allocation5], 4294967040 }
 0x2c4   :  { %267 = vsyncpa [#allocation5], 1 }

</bundles_post_ra>
